<compile_context>
chip_gen: v7x
topology: tpu7x:2x2x1
jax: 0.10.0
libtpu: 0.0.40
codegen_flags: <defaults>
</compile_context>

<pallas_src>
from functools import partial

import jax
import jax.numpy as jnp
from jax import lax
from jax.experimental import pallas as pl
from jax.experimental.pallas import tpu as pltpu


def _hardtanh(x):
    return jnp.clip(x, -1.0, 1.0)


def stacked_ae_kernel(
    x_ref,
    w1e_ref, b1e_ref, w2e_ref, b2e_ref, w3e_ref, b3e_ref,
    w3d_ref, b3d_ref, w2d_ref, b2d_ref, w1d_ref, b1d_ref,
    xr_ref, loss_ref,
    *, tb, true_b,
):
    x = x_ref[...]  # [TB, 256] f32

    # Encoder: Linear + ReLU. Inner layers are zero-padded to 128 lanes; the
    # padded lanes stay exactly 0 through relu/hardtanh and zero weight rows.
    h1 = jnp.maximum(
        jnp.dot(x, w1e_ref[...], preferred_element_type=jnp.float32) + b1e_ref[...], 0.0)
    h2 = jnp.maximum(
        jnp.dot(h1, w2e_ref[...], preferred_element_type=jnp.float32) + b2e_ref[...], 0.0)
    h3 = jnp.maximum(
        jnp.dot(h2, w3e_ref[...], preferred_element_type=jnp.float32) + b3e_ref[...], 0.0)

    # Decoder (reconstruct): Linear + Hardtanh.
    r3 = _hardtanh(
        jnp.dot(h3, w3d_ref[...], preferred_element_type=jnp.float32) + b3d_ref[...])
    r2 = _hardtanh(
        jnp.dot(r3, w2d_ref[...], preferred_element_type=jnp.float32) + b2d_ref[...])
    xr = _hardtanh(
        jnp.dot(r2, w1d_ref[...], preferred_element_type=jnp.float32) + b1d_ref[...])

    xr_ref[...] = xr

    # PairwiseDistance(p=1, eps=1e-6): per-row sum |xr - x + eps| (axis=-1 is an
    # XLU reduction -> effectively free filler), mask out padded batch rows,
    # write the per-tile partial SUM to SMEM. Mean (divide by true B) in wrapper.
    eps = jnp.float32(1e-6)
    per_row = jnp.sum(jnp.abs(xr - x + eps), axis=1, keepdims=True)        # [TB, 1]
    row_ids = pl.program_id(0) * tb + lax.broadcasted_iota(jnp.int32, (tb, 1), 0)
    valid = row_ids < true_b
    loss_ref[0, 0] = jnp.sum(jnp.where(valid, per_row, 0.0))


def make_params(key):
    """Deterministic PyTorch-Linear-style init: U(-1/sqrt(fan_in), 1/sqrt(fan_in)).

    Returns weights transposed to (in_features, out_features) and biases shaped
    (1, out_features) — the *logical* (unpadded) parameters.
    """
    dims_enc = [(256, 128), (128, 64), (64, 32)]     # ae1, ae2, ae3 forward_pass
    dims_dec = [(32, 64), (64, 128), (128, 256)]     # ae3, ae2, ae1 backward_pass
    params = []
    for (fan_in, fan_out) in dims_enc + dims_dec:
        key, kw, kb = jax.random.split(key, 3)
        bound = 1.0 / jnp.sqrt(jnp.float32(fan_in))
        w = jax.random.uniform(kw, (fan_in, fan_out), jnp.float32, -bound, bound)
        b = jax.random.uniform(kb, (1, fan_out), jnp.float32, -bound, bound)
        params.append((w, b))
    return params  # [(w1e,b1e),(w2e,b2e),(w3e,b3e),(w3d,b3d),(w2d,b2d),(w1d,b1d)]


def _pad_params(params):
    """Zero-pad 32/64-wide layers to 128 so every intermediate is 128-lane dense.

    Exact-math preserving: padded output columns have zero weights + zero bias,
    so relu/hardtanh keep those lanes at 0, and padded input rows are zero
    weights so they contribute nothing downstream.
    """
    def pad_to(a, shape):
        return jnp.pad(a, [(0, t - s) for s, t in zip(a.shape, shape)])

    (w1e, b1e), (w2e, b2e), (w3e, b3e), (w3d, b3d), (w2d, b2d), (w1d, b1d) = params
    return [
        (w1e, b1e),                                                   # 256 -> 128
        (pad_to(w2e, (128, 128)), pad_to(b2e, (1, 128))),             # 128 -> 64(->128)
        (pad_to(w3e, (128, 128)), pad_to(b3e, (1, 128))),             # 64  -> 32(->128)
        (pad_to(w3d, (128, 128)), pad_to(b3d, (1, 128))),             # 32  -> 64(->128)
        (pad_to(w2d, (128, 128)), pad_to(b2d, (1, 128))),             # 64  -> 128
        (w1d, b1d),                                                   # 128 -> 256
    ]


@partial(jax.jit, static_argnames=("block_b",))
def stacked_autoencoder_forward(x_nchw, params, block_b=512):
    # Glue: slice exactly like x[:, 0, 0, :] in the PyTorch module.
    x = x_nchw[:, 0, 0, :].astype(jnp.float32)          # [B, 256]
    B = x.shape[0]

    TB = int(block_b)
    num_tiles = pl.cdiv(B, TB)
    B_pad = num_tiles * TB
    x_p = jnp.pad(x, ((0, B_pad - B), (0, 0)))          # padded rows masked in-kernel

    padded = _pad_params(params)
    flat = [x_p]
    for (w, b) in padded:
        flat.extend([w, b])

    # x / xr: tiled over the batch grid. Weights/biases: full-extent blocks with
    # constant index maps -> DMA'd once, resident in VMEM across the whole grid.
    x_spec = pl.BlockSpec((TB, 256), lambda i: (i, 0))
    param_specs = []
    for (w, b) in padded:
        param_specs.append(pl.BlockSpec(w.shape, lambda i: (0, 0)))
        param_specs.append(pl.BlockSpec(b.shape, lambda i: (0, 0)))

    xr_spec = pl.BlockSpec((TB, 256), lambda i: (i, 0))
    loss_spec = pl.BlockSpec((1, 1), lambda i: (i, 0),
                             memory_space=pltpu.MemorySpace.SMEM)

    xr_pad, loss_partials = pl.pallas_call(
        partial(stacked_ae_kernel, tb=TB, true_b=B),
        grid=(num_tiles,),
        out_shape=(
            jax.ShapeDtypeStruct((B_pad, 256), jnp.float32),
            jax.ShapeDtypeStruct((num_tiles, 1), jnp.float32),
        ),
        in_specs=[x_spec] + param_specs,
        out_specs=(xr_spec, loss_spec),
        compiler_params=pltpu.CompilerParams(
            dimension_semantics=("parallel",)),   # v7x: shard batch tiles over 2 TCs
    )(*flat)

    xr = xr_pad[:B]
    loss = jnp.sum(loss_partials) / jnp.float32(B)
    return xr, loss


def _reference(x_nchw, params):
    x = x_nchw[:, 0, 0, :].astype(jnp.float32)
    (w1e, b1e), (w2e, b2e), (w3e, b3e), (w3d, b3d), (w2d, b2d), (w1d, b1d) = params
    h = jnp.maximum(x @ w1e + b1e, 0.0)
    h = jnp.maximum(h @ w2e + b2e, 0.0)
    h = jnp.maximum(h @ w3e + b3e, 0.0)
    r = jnp.clip(h @ w3d + b3d, -1.0, 1.0)
    r = jnp.clip(r @ w2d + b2d, -1.0, 1.0)
    xr = jnp.clip(r @ w1d + b1d, -1.0, 1.0)
    loss = jnp.mean(jnp.sum(jnp.abs(xr - x + 1e-6), axis=1))
    return xr, loss


if __name__ == "__main__":
    key = jax.random.PRNGKey(0)
    kx, kp = jax.random.split(key)

    # Small NCHW-ish input; last dim must be 256 (ae1 input size).
    B, C, H, W = 2, 4, 16, 256
    x_nchw = jax.random.normal(kx, (B, C, H, W), dtype=jnp.float32)
    params = make_params(kp)

    # Small batch tile so the tiny demo input still exercises the gridded path.
    xr, loss = stacked_autoencoder_forward(x_nchw, params, block_b=8)
    jax.block_until_ready((xr, loss))

    xr_ref, loss_ref = _reference(x_nchw, params)
    assert xr.shape == (B, 256) and xr.dtype == jnp.float32
    assert jnp.allclose(xr, xr_ref, atol=1e-5, rtol=1e-5)
    assert jnp.allclose(loss, loss_ref, atol=1e-3, rtol=1e-5)

    # Multi-tile + ragged last tile (B=20, TB=8 -> 3 tiles, 4 padded rows masked).
    B2 = 20
    x2_nchw = jax.random.normal(jax.random.PRNGKey(1), (B2, C, H, W), dtype=jnp.float32)
    xr2, loss2 = stacked_autoencoder_forward(x2_nchw, params, block_b=8)
    jax.block_until_ready((xr2, loss2))
    xr2_ref, loss2_ref = _reference(x2_nchw, params)
    assert xr2.shape == (B2, 256)
    assert jnp.allclose(xr2, xr2_ref, atol=1e-5, rtol=1e-5)
    assert jnp.allclose(loss2, loss2_ref, atol=1e-3, rtol=1e-5)

    print("KERNEL_OK")
</pallas_src>

<mosaic_0001>
module attributes {stable_mosaic.version = 11 : i64} {
  func.func @stacked_ae_kernel(%arg0: i32, %arg1: memref<8x256xf32, #tpu.memory_space<vmem>>, %arg2: memref<256x128xf32, #tpu.memory_space<vmem>>, %arg3: memref<1x128xf32, #tpu.memory_space<vmem>>, %arg4: memref<128x128xf32, #tpu.memory_space<vmem>>, %arg5: memref<1x128xf32, #tpu.memory_space<vmem>>, %arg6: memref<128x128xf32, #tpu.memory_space<vmem>>, %arg7: memref<1x128xf32, #tpu.memory_space<vmem>>, %arg8: memref<128x128xf32, #tpu.memory_space<vmem>>, %arg9: memref<1x128xf32, #tpu.memory_space<vmem>>, %arg10: memref<128x128xf32, #tpu.memory_space<vmem>>, %arg11: memref<1x128xf32, #tpu.memory_space<vmem>>, %arg12: memref<128x256xf32, #tpu.memory_space<vmem>>, %arg13: memref<1x256xf32, #tpu.memory_space<vmem>>, %arg14: memref<8x256xf32, #tpu.memory_space<vmem>>, %arg15: memref<1x1xf32, #tpu.memory_space<smem>>) attributes {dimension_semantics = [#tpu.dimension_semantics<parallel>], iteration_bounds = array<i64: 1>, scalar_prefetch = 0 : i64, scratch_operands = 0 : i64, tpu.core_type = #tpu.core_type<tc>, window_params = [{transform_indices = @transform_0, window_bounds = array<i64: 8, 256>}, {pipeline_mode = #tpu.pipeline_mode<synchronous>, transform_indices = @transform_1, window_bounds = array<i64: 256, 128>}, {pipeline_mode = #tpu.pipeline_mode<synchronous>, transform_indices = @transform_2, window_bounds = array<i64: 1, 128>}, {pipeline_mode = #tpu.pipeline_mode<synchronous>, transform_indices = @transform_3, window_bounds = array<i64: 128, 128>}, {pipeline_mode = #tpu.pipeline_mode<synchronous>, transform_indices = @transform_4, window_bounds = array<i64: 1, 128>}, {pipeline_mode = #tpu.pipeline_mode<synchronous>, transform_indices = @transform_5, window_bounds = array<i64: 128, 128>}, {pipeline_mode = #tpu.pipeline_mode<synchronous>, transform_indices = @transform_6, window_bounds = array<i64: 1, 128>}, {pipeline_mode = #tpu.pipeline_mode<synchronous>, transform_indices = @transform_7, window_bounds = array<i64: 128, 128>}, {pipeline_mode = #tpu.pipeline_mode<synchronous>, transform_indices = @transform_8, window_bounds = array<i64: 1, 128>}, {pipeline_mode = #tpu.pipeline_mode<synchronous>, transform_indices = @transform_9, window_bounds = array<i64: 128, 128>}, {pipeline_mode = #tpu.pipeline_mode<synchronous>, transform_indices = @transform_10, window_bounds = array<i64: 1, 128>}, {pipeline_mode = #tpu.pipeline_mode<synchronous>, transform_indices = @transform_11, window_bounds = array<i64: 128, 256>}, {pipeline_mode = #tpu.pipeline_mode<synchronous>, transform_indices = @transform_12, window_bounds = array<i64: 1, 256>}, {transform_indices = @transform_13, window_bounds = array<i64: 8, 256>}, {transform_indices = @transform_14, window_bounds = array<i64: 1, 1>}]} {
    %c0 = arith.constant 0 : index
    %c0_0 = arith.constant 0 : index
    %0 = vector.load %arg1[%c0, %c0_0] : memref<8x256xf32, #tpu.memory_space<vmem>>, vector<8x256xf32>
    %c0_1 = arith.constant 0 : index
    %c0_2 = arith.constant 0 : index
    %1 = vector.load %arg2[%c0_1, %c0_2] : memref<256x128xf32, #tpu.memory_space<vmem>>, vector<256x128xf32>
    %cst = arith.constant dense<0.000000e+00> : vector<8x128xf32>
    %2 = tpu.matmul %0, %1, %cst {dimension_numbers = #tpu.dot_dimension_numbers<[1], [0], [0], [1], [0, 0, 1, 1], [], []>} : vector<8x256xf32>, vector<256x128xf32>, vector<8x128xf32> -> vector<8x128xf32>
    %c0_3 = arith.constant 0 : index
    %c0_4 = arith.constant 0 : index
    %3 = vector.load %arg3[%c0_3, %c0_4] : memref<1x128xf32, #tpu.memory_space<vmem>>, vector<1x128xf32>
    %4 = vector.broadcast %3 : vector<1x128xf32> to vector<8x128xf32>
    %5 = arith.addf %2, %4 : vector<8x128xf32>
    %cst_5 = arith.constant 0.000000e+00 : f32
    %6 = vector.broadcast %cst_5 : f32 to vector<8x128xf32>
    %7 = arith.maximumf %5, %6 : vector<8x128xf32>
    %c0_6 = arith.constant 0 : index
    %c0_7 = arith.constant 0 : index
    %8 = vector.load %arg4[%c0_6, %c0_7] : memref<128x128xf32, #tpu.memory_space<vmem>>, vector<128x128xf32>
    %cst_8 = arith.constant dense<0.000000e+00> : vector<8x128xf32>
    %9 = tpu.matmul %7, %8, %cst_8 {dimension_numbers = #tpu.dot_dimension_numbers<[1], [0], [0], [1], [0, 0, 1, 1], [], []>} : vector<8x128xf32>, vector<128x128xf32>, vector<8x128xf32> -> vector<8x128xf32>
    %c0_9 = arith.constant 0 : index
    %c0_10 = arith.constant 0 : index
    %10 = vector.load %arg5[%c0_9, %c0_10] : memref<1x128xf32, #tpu.memory_space<vmem>>, vector<1x128xf32>
    %11 = vector.broadcast %10 : vector<1x128xf32> to vector<8x128xf32>
    %12 = arith.addf %9, %11 : vector<8x128xf32>
    %cst_11 = arith.constant 0.000000e+00 : f32
    %13 = vector.broadcast %cst_11 : f32 to vector<8x128xf32>
    %14 = arith.maximumf %12, %13 : vector<8x128xf32>
    %c0_12 = arith.constant 0 : index
    %c0_13 = arith.constant 0 : index
    %15 = vector.load %arg6[%c0_12, %c0_13] : memref<128x128xf32, #tpu.memory_space<vmem>>, vector<128x128xf32>
    %cst_14 = arith.constant dense<0.000000e+00> : vector<8x128xf32>
    %16 = tpu.matmul %14, %15, %cst_14 {dimension_numbers = #tpu.dot_dimension_numbers<[1], [0], [0], [1], [0, 0, 1, 1], [], []>} : vector<8x128xf32>, vector<128x128xf32>, vector<8x128xf32> -> vector<8x128xf32>
    %c0_15 = arith.constant 0 : index
    %c0_16 = arith.constant 0 : index
    %17 = vector.load %arg7[%c0_15, %c0_16] : memref<1x128xf32, #tpu.memory_space<vmem>>, vector<1x128xf32>
    %18 = vector.broadcast %17 : vector<1x128xf32> to vector<8x128xf32>
    %19 = arith.addf %16, %18 : vector<8x128xf32>
    %cst_17 = arith.constant 0.000000e+00 : f32
    %20 = vector.broadcast %cst_17 : f32 to vector<8x128xf32>
    %21 = arith.maximumf %19, %20 : vector<8x128xf32>
    %c0_18 = arith.constant 0 : index
    %c0_19 = arith.constant 0 : index
    %22 = vector.load %arg8[%c0_18, %c0_19] : memref<128x128xf32, #tpu.memory_space<vmem>>, vector<128x128xf32>
    %cst_20 = arith.constant dense<0.000000e+00> : vector<8x128xf32>
    %23 = tpu.matmul %21, %22, %cst_20 {dimension_numbers = #tpu.dot_dimension_numbers<[1], [0], [0], [1], [0, 0, 1, 1], [], []>} : vector<8x128xf32>, vector<128x128xf32>, vector<8x128xf32> -> vector<8x128xf32>
    %c0_21 = arith.constant 0 : index
    %c0_22 = arith.constant 0 : index
    %24 = vector.load %arg9[%c0_21, %c0_22] : memref<1x128xf32, #tpu.memory_space<vmem>>, vector<1x128xf32>
    %25 = vector.broadcast %24 : vector<1x128xf32> to vector<8x128xf32>
    %26 = arith.addf %23, %25 : vector<8x128xf32>
    %cst_23 = arith.constant -1.000000e+00 : f32
    %cst_24 = arith.constant 1.000000e+00 : f32
    %27 = vector.broadcast %cst_23 : f32 to vector<8x128xf32>
    %28 = arith.maximumf %27, %26 : vector<8x128xf32>
    %29 = vector.broadcast %cst_24 : f32 to vector<8x128xf32>
    %30 = arith.minimumf %29, %28 : vector<8x128xf32>
    %c0_25 = arith.constant 0 : index
    %c0_26 = arith.constant 0 : index
    %31 = vector.load %arg10[%c0_25, %c0_26] : memref<128x128xf32, #tpu.memory_space<vmem>>, vector<128x128xf32>
    %cst_27 = arith.constant dense<0.000000e+00> : vector<8x128xf32>
    %32 = tpu.matmul %30, %31, %cst_27 {dimension_numbers = #tpu.dot_dimension_numbers<[1], [0], [0], [1], [0, 0, 1, 1], [], []>} : vector<8x128xf32>, vector<128x128xf32>, vector<8x128xf32> -> vector<8x128xf32>
    %c0_28 = arith.constant 0 : index
    %c0_29 = arith.constant 0 : index
    %33 = vector.load %arg11[%c0_28, %c0_29] : memref<1x128xf32, #tpu.memory_space<vmem>>, vector<1x128xf32>
    %34 = vector.broadcast %33 : vector<1x128xf32> to vector<8x128xf32>
    %35 = arith.addf %32, %34 : vector<8x128xf32>
    %cst_30 = arith.constant -1.000000e+00 : f32
    %cst_31 = arith.constant 1.000000e+00 : f32
    %36 = vector.broadcast %cst_30 : f32 to vector<8x128xf32>
    %37 = arith.maximumf %36, %35 : vector<8x128xf32>
    %38 = vector.broadcast %cst_31 : f32 to vector<8x128xf32>
    %39 = arith.minimumf %38, %37 : vector<8x128xf32>
    %c0_32 = arith.constant 0 : index
    %c0_33 = arith.constant 0 : index
    %40 = vector.load %arg12[%c0_32, %c0_33] : memref<128x256xf32, #tpu.memory_space<vmem>>, vector<128x256xf32>
    %cst_34 = arith.constant dense<0.000000e+00> : vector<8x256xf32>
    %41 = tpu.matmul %39, %40, %cst_34 {dimension_numbers = #tpu.dot_dimension_numbers<[1], [0], [0], [1], [0, 0, 1, 1], [], []>} : vector<8x128xf32>, vector<128x256xf32>, vector<8x256xf32> -> vector<8x256xf32>
    %c0_35 = arith.constant 0 : index
    %c0_36 = arith.constant 0 : index
    %42 = vector.load %arg13[%c0_35, %c0_36] : memref<1x256xf32, #tpu.memory_space<vmem>>, vector<1x256xf32>
    %43 = vector.broadcast %42 : vector<1x256xf32> to vector<8x256xf32>
    %44 = arith.addf %41, %43 : vector<8x256xf32>
    %cst_37 = arith.constant -1.000000e+00 : f32
    %cst_38 = arith.constant 1.000000e+00 : f32
    %45 = vector.broadcast %cst_37 : f32 to vector<8x256xf32>
    %46 = arith.maximumf %45, %44 : vector<8x256xf32>
    %47 = vector.broadcast %cst_38 : f32 to vector<8x256xf32>
    %48 = arith.minimumf %47, %46 : vector<8x256xf32>
    %c0_39 = arith.constant 0 : index
    %c0_40 = arith.constant 0 : index
    %49 = vector.load %arg14[%c0_39, %c0_40] : memref<8x256xf32, #tpu.memory_space<vmem>>, vector<8x256xf32>
    tpu.vector_store %arg14[%c0_39, %c0_40], %48 {strides = array<i32>} : memref<8x256xf32, #tpu.memory_space<vmem>>, vector<8x256xf32>,
    %50 = arith.subf %48, %0 : vector<8x256xf32>
    %cst_41 = arith.constant 9.99999997E-7 : f32
    %51 = vector.broadcast %cst_41 : f32 to vector<8x256xf32>
    %52 = arith.addf %50, %51 : vector<8x256xf32>
    %53 = math.absf %52 : vector<8x256xf32>
    %cst_42 = arith.constant dense<0.000000e+00> : vector<8xf32>
    %54 = vector.multi_reduction <add>, %53, %cst_42 [1] : vector<8x256xf32> to vector<8xf32>
    %55 = vector.shape_cast %54 : vector<8xf32> to vector<8x1xf32>
    %c8_i32 = arith.constant 8 : i32
    %56 = arith.muli %arg0, %c8_i32 : i32
    %57 = tpu.iota {dimensions = array<i32: 0>} : vector<8x1xi32>
    %58 = vector.broadcast %56 : i32 to vector<8x1xi32>
    %59 = arith.addi %58, %57 : vector<8x1xi32>
    %c2_i32 = arith.constant 2 : i32
    %60 = vector.broadcast %c2_i32 : i32 to vector<8x1xi32>
    %61 = arith.cmpi slt, %59, %60 : vector<8x1xi32>
    %cst_43 = arith.constant 0.000000e+00 : f32
    %62 = vector.broadcast %cst_43 : f32 to vector<8x1xf32>
    %63 = arith.select %61, %55, %62 : vector<8x1xi1>, vector<8x1xf32>
    %64 = vector.shape_cast %63 : vector<8x1xf32> to vector<1x8x1xf32>
    %cst_44 = arith.constant dense<0.000000e+00> : vector<1xf32>
    %65 = vector.multi_reduction <add>, %64, %cst_44 [1, 2] : vector<1x8x1xf32> to vector<1xf32>
    %66 = vector.shape_cast %65 : vector<1xf32> to vector<1x1x1xf32>
    %67 = vector.extract %66[0, 0, 0] : f32 from vector<1x1x1xf32>
    %c0_45 = arith.constant 0 : index
    %c0_46 = arith.constant 0 : index
    %68 = memref.load %arg15[%c0_45, %c0_46] : memref<1x1xf32, #tpu.memory_space<smem>>
    memref.store %67, %arg15[%c0_45, %c0_46] : memref<1x1xf32, #tpu.memory_space<smem>>
    return
  }
  func.func @transform_0(%arg0: i32) -> (i32, i32) {
    %c0_i32 = arith.constant 0 : i32
    %c0_i32_0 = arith.constant 0 : i32
    return %arg0, %c0_i32 : i32, i32
  }
  func.func @transform_1(%arg0: i32) -> (i32, i32) {
    %c0_i32 = arith.constant 0 : i32
    %c0_i32_0 = arith.constant 0 : i32
    %c0_i32_1 = arith.constant 0 : i32
    return %c0_i32, %c0_i32_0 : i32, i32
  }
  func.func @transform_2(%arg0: i32) -> (i32, i32) {
    %c0_i32 = arith.constant 0 : i32
    %c0_i32_0 = arith.constant 0 : i32
    %c0_i32_1 = arith.constant 0 : i32
    return %c0_i32, %c0_i32_0 : i32, i32
  }
  func.func @transform_3(%arg0: i32) -> (i32, i32) {
    %c0_i32 = arith.constant 0 : i32
    %c0_i32_0 = arith.constant 0 : i32
    %c0_i32_1 = arith.constant 0 : i32
    return %c0_i32, %c0_i32_0 : i32, i32
  }
  func.func @transform_4(%arg0: i32) -> (i32, i32) {
    %c0_i32 = arith.constant 0 : i32
    %c0_i32_0 = arith.constant 0 : i32
    %c0_i32_1 = arith.constant 0 : i32
    return %c0_i32, %c0_i32_0 : i32, i32
  }
  func.func @transform_5(%arg0: i32) -> (i32, i32) {
    %c0_i32 = arith.constant 0 : i32
    %c0_i32_0 = arith.constant 0 : i32
    %c0_i32_1 = arith.constant 0 : i32
    return %c0_i32, %c0_i32_0 : i32, i32
  }
  func.func @transform_6(%arg0: i32) -> (i32, i32) {
    %c0_i32 = arith.constant 0 : i32
    %c0_i32_0 = arith.constant 0 : i32
    %c0_i32_1 = arith.constant 0 : i32
    return %c0_i32, %c0_i32_0 : i32, i32
  }
  func.func @transform_7(%arg0: i32) -> (i32, i32) {
    %c0_i32 = arith.constant 0 : i32
    %c0_i32_0 = arith.constant 0 : i32
    %c0_i32_1 = arith.constant 0 : i32
    return %c0_i32, %c0_i32_0 : i32, i32
  }
  func.func @transform_8(%arg0: i32) -> (i32, i32) {
    %c0_i32 = arith.constant 0 : i32
    %c0_i32_0 = arith.constant 0 : i32
    %c0_i32_1 = arith.constant 0 : i32
    return %c0_i32, %c0_i32_0 : i32, i32
  }
  func.func @transform_9(%arg0: i32) -> (i32, i32) {
    %c0_i32 = arith.constant 0 : i32
    %c0_i32_0 = arith.constant 0 : i32
    %c0_i32_1 = arith.constant 0 : i32
    return %c0_i32, %c0_i32_0 : i32, i32
  }
  func.func @transform_10(%arg0: i32) -> (i32, i32) {
    %c0_i32 = arith.constant 0 : i32
    %c0_i32_0 = arith.constant 0 : i32
    %c0_i32_1 = arith.constant 0 : i32
    return %c0_i32, %c0_i32_0 : i32, i32
  }
  func.func @transform_11(%arg0: i32) -> (i32, i32) {
    %c0_i32 = arith.constant 0 : i32
    %c0_i32_0 = arith.constant 0 : i32
    %c0_i32_1 = arith.constant 0 : i32
    return %c0_i32, %c0_i32_0 : i32, i32
  }
  func.func @transform_12(%arg0: i32) -> (i32, i32) {
    %c0_i32 = arith.constant 0 : i32
    %c0_i32_0 = arith.constant 0 : i32
    %c0_i32_1 = arith.constant 0 : i32
    return %c0_i32, %c0_i32_0 : i32, i32
  }
  func.func @transform_13(%arg0: i32) -> (i32, i32) {
    %c0_i32 = arith.constant 0 : i32
    %c0_i32_0 = arith.constant 0 : i32
    return %arg0, %c0_i32 : i32, i32
  }
  func.func @transform_14(%arg0: i32) -> (i32, i32) {
    %c0_i32 = arith.constant 0 : i32
    %c0_i32_0 = arith.constant 0 : i32
    return %arg0, %c0_i32 : i32, i32
  }
}

</mosaic_0001>

<bundles_post_ra>
// kernel: stacked_autoencoder_forward.1
= control target key start
LH: loop header
LB: loop body
LE: loop exit
PB: predicated region body
PF: predicated region fallthrough
CT: control target
= control target key end

     0   :  { %v1134_v7 = vmov 0.0|0.0   ;;  %s1688_s0 = inlined_call_operand.vmem [shape: f32[8,256], index: 0, kind: input, shape index: {}]   ;;  %s1689_s1 = inlined_call_operand.vmem [shape: f32[256,128], index: 1, kind: input, shape index: {}]   ;;  %s1690_s2 = inlined_call_operand.vmem [shape: f32[1,128], index: 2, kind: input, shape index: {}]   ;;  %s1691_s3 = inlined_call_operand.vmem [shape: f32[128,128], index: 3, kind: input, shape index: {}]   ;;  %s1692_s4 = inlined_call_operand.vmem [shape: f32[1,128], index: 4, kind: input, shape index: {}]   ;;  %s1693_s5 = inlined_call_operand.vmem [shape: f32[128,128], index: 5, kind: input, shape index: {}]   ;;  %s1694_s6 = inlined_call_operand.vmem [shape: f32[1,128], index: 6, kind: input, shape index: {}]   ;;  %s1695_s7 = inlined_call_operand.vmem [shape: f32[128,128], index: 7, kind: input, shape index: {}]   ;;  %s1696_s8 = inlined_call_operand.vmem [shape: f32[1,128], index: 8, kind: input, shape index: {}]   ;;  %s1697_s9 = inlined_call_operand.vmem [shape: f32[128,128], index: 9, kind: input, shape index: {}]   ;;  %s1698_s10 = inlined_call_operand.vmem [shape: f32[1,128], index: 10, kind: input, shape index: {}]   ;;  %s1699_s11 = inlined_call_operand.vmem [shape: f32[128,256], index: 11, kind: input, shape index: {}]   ;;  %s1700_s12 = inlined_call_operand.vmem [shape: f32[1,256], index: 12, kind: input, shape index: {}]   ;;  %s1701_s13 = inlined_call_operand.vmem [shape: f32[8,256], index: 13, kind: output, shape index: {0}]   ;;  %s1702_s14 = inlined_call_operand.hbm [shape: f32[1,1], index: 14, kind: output, shape index: {1}]  }
   0x1   :  { %v65_v0 = vld [vmem:[%s1689_s1 + $0x80] sm:$0xff]  ;;  %v66_v1 = vld [vmem:[%s1689_s1 + $0x88] sm:$0xff]  ;;  %v67_v5 = vld [vmem:[%s1689_s1 + $0x90] sm:$0xff]  ;;  %988 = vmatprep.subr.bf16.mxu1 %v1134_v7 }
   0x2   :  { %v49_v2 = vld [vmem:[%s1689_s1] sm:$0xff]  ;;  %v956_v3 = vpack.c.bf16 %v66_v1, %v65_v0  ;;  %v50_v4 = vld [vmem:[%s1689_s1 + $0x8] sm:$0xff]  ;;  %v68_v6 = vld [vmem:[%s1689_s1 + $0x98] sm:$0xff] }
   0x3   :  { %v958_v8 = vpack.c.bf16 %v50_v4, %v49_v2  ;;  %v960_v9 = vpack.c.bf16 %v68_v6, %v67_v5  ;;  %v51_v10 = vld [vmem:[%s1689_s1 + $0x10] sm:$0xff]  ;;  %v52_v11 = vld [vmem:[%s1689_s1 + $0x18] sm:$0xff]  ;;  %v69_v12 = vld [vmem:[%s1689_s1 + $0xa0] sm:$0xff] }
   0x4   :  { %957 = vmatprep.subr.bf16.mxu0 %v956_v3  ;;  %v70_v13 = vld [vmem:[%s1689_s1 + $0xa8] sm:$0xff]  ;;  %v962_v14 = vpack.c.bf16 %v52_v11, %v51_v10  ;;  %v53_v16 = vld [vmem:[%s1689_s1 + $0x20] sm:$0xff]  ;;  %v71_v18 = vld [vmem:[%s1689_s1 + $0xb0] sm:$0xff] }
   0x5   :  { %959 = vmatpush3.bf16.msra.mxu0 %v958_v8  ;;  %v964_v15 = vpack.c.bf16 %v70_v13, %v69_v12  ;;  %v54_v17 = vld [vmem:[%s1689_s1 + $0x28] sm:$0xff]  ;;  %v72_v19 = vld [vmem:[%s1689_s1 + $0xb8] sm:$0xff]  ;;  %v55_v22 = vld [vmem:[%s1689_s1 + $0x30] sm:$0xff] }
   0x6   :  { %961 = vmatprep.subr.bf16.mxu0 %v960_v9  ;;  %v966_v20 = vpack.c.bf16 %v54_v17, %v53_v16  ;;  %v968_v21 = vpack.c.bf16 %v72_v19, %v71_v18  ;;  %v56_v23 = vld [vmem:[%s1689_s1 + $0x38] sm:$0xff]  ;;  %v73_v24 = vld [vmem:[%s1689_s1 + $0xc0] sm:$0xff]  ;;  %v74_v25 = vld [vmem:[%s1689_s1 + $0xc8] sm:$0xff] }
   0x7   :  { %v1271_v26 = vld [vmem:[%s1688_s0 + $0x8] sm:$0xff]  ;;  %v159_v27 = vld [vmem:[%s1691_s3] sm:$0xff]  ;;  %v970_v29 = vpack.c.bf16 %v56_v23, %v55_v22  ;;  %v161_v31 = vld [vmem:[%s1691_s3 + $0x10] sm:$0xff]  ;;  %v972_v33 = vpack.c.bf16 %v74_v25, %v73_v24 }
   0x8   :  { %152 = vmatprep.mubr.f32.mxu0 %v1271_v26  ;;  %v160_v28 = vld [vmem:[%s1691_s3 + $0x8] sm:$0xff]  ;;  %v162_v32 = vld [vmem:[%s1691_s3 + $0x18] sm:$0xff]  ;;  %v57_v34 = vld [vmem:[%s1689_s1 + $0x40] sm:$0xff] }
   0x9   :  { %963 = vmatpush3.bf16.msra.mxu0 %v962_v14  ;;  %v989_v30 = vpack.c.bf16 %v160_v28, %v159_v27  ;;  %v58_v35 = vld [vmem:[%s1689_s1 + $0x48] sm:$0xff]  ;;  %v75_v36 = vld [vmem:[%s1689_s1 + $0xd0] sm:$0xff]  ;;  %v76_v37 = vld [vmem:[%s1689_s1 + $0xd8] sm:$0xff]  ;;  %v992_v38 = vpack.c.bf16 %v162_v32, %v161_v31 }
   0xa   :  { %965 = vmatprep.subr.bf16.mxu0 %v964_v15  ;;  %v163_v39 = vld [vmem:[%s1691_s3 + $0x20] sm:$0xff]  ;;  %v164_v40 = vld [vmem:[%s1691_s3 + $0x28] sm:$0xff] }
   0xb   :  { %990 = vmatpush3.bf16.msra.mxu1 %v989_v30 }
   0xc   :  { %991 = vmatprep.subr.bf16.mxu1 %v1134_v7 }
   0xd   :  { %967 = vmatpush3.bf16.msra.mxu0 %v966_v20 }
   0xe   :  { %969 = vmatprep.subr.bf16.mxu0 %v968_v21 }
   0xf   :  { %20 = vsyncpa [#allocation3], 0  ;;  %v974_v41 = vpack.c.bf16 %v58_v35, %v57_v34  ;;  %v976_v42 = vpack.c.bf16 %v76_v37, %v75_v36  ;;  %v59_v43 = vld [vmem:[%s1689_s1 + $0x50] sm:$0xff]  ;;  %v60_v44 = vld [vmem:[%s1689_s1 + $0x58] sm:$0xff]  ;;  %993 = vmatpush3.bf16.msra.mxu1 %v992_v38  ;;  %v995_v47 = vpack.c.bf16 %v164_v40, %v163_v39  ;;  %vm1135_vm0 = vmmov 0  }
  0x10   :  { %v77_v45 = vld [vmem:[%s1689_s1 + $0xe0] sm:$0xff]  ;;  %v78_v46 = vld [vmem:[%s1689_s1 + $0xe8] sm:$0xff]  ;;  %994 = vmatprep.subr.bf16.mxu1 %v1134_v7  ;;  %v165_v48 = vld [vmem:[%s1691_s3 + $0x30] sm:$0xff]  ;;  %v978_v50 = vpack.c.bf16 %v60_v44, %v59_v43  ;;  %v1136_v12 = vmov 0.0   ;;  %vm674_vm2 = vcmask 7168  }
  0x11   :  { %971 = vmatpush3.bf16.msra.mxu0 %v970_v29  ;;  %v166_v49 = vld [vmem:[%s1691_s3 + $0x38] sm:$0xff]  ;;  %v980_v51 = vpack.c.bf16 %v78_v46, %v77_v45  ;;  %v61_v52 = vld [vmem:[%s1689_s1 + $0x60] sm:$0xff]  ;;  %v62_v53 = vld [vmem:[%s1689_s1 + $0x68] sm:$0xff]  ;;  %848 = vmatprep.mubr.msk.f32.mxu1 %vm1135_vm0, %v1136_v12 }
  0x12   :  { %973 = vmatprep.subr.bf16.mxu0 %v972_v33  ;;  %v79_v54 = vld [vmem:[%s1689_s1 + $0xf0] sm:$0xff]  ;;  %v80_v55 = vld [vmem:[%s1689_s1 + $0xf8] sm:$0xff]  ;;  %v998_v56 = vpack.c.bf16 %v166_v49, %v165_v48  ;;  %v167_v57 = vld [vmem:[%s1691_s3 + $0x40] sm:$0xff]  ;;  %v982_v59 = vpack.c.bf16 %v62_v53, %v61_v52 }
  0x13   :  { %996 = vmatpush3.bf16.msra.mxu1 %v995_v47  ;;  %v168_v58 = vld [vmem:[%s1691_s3 + $0x48] sm:$0xff]  ;;  %v984_v60 = vpack.c.bf16 %v80_v55, %v79_v54  ;;  %v63_v61 = vld [vmem:[%s1689_s1 + $0x70] sm:$0xff]  ;;  %v64_v62 = vld [vmem:[%s1689_s1 + $0x78] sm:$0xff] }
  0x14   :  { %997 = vmatprep.subr.bf16.mxu1 %v1134_v7  ;;  %v1001_v63 = vpack.c.bf16 %v168_v58, %v167_v57  ;;  %v169_v0 = vld [vmem:[%s1691_s3 + $0x50] sm:$0xff]  ;;  %v170_v1 = vld [vmem:[%s1691_s3 + $0x58] sm:$0xff]  ;;  %v986_v2 = vpack.c.bf16 %v64_v62, %v63_v61  ;;  %v1360_v4 = vld [vmem:[%s1688_s0] sm:$0xff] }
  0x15   :  { %975 = vmatpush3.bf16.msra.mxu0 %v974_v41  ;;  %v1004_v3 = vpack.c.bf16 %v170_v1, %v169_v0  ;;  %v171_v5 = vld [vmem:[%s1691_s3 + $0x60] sm:$0xff]  ;;  %v172_v6 = vld [vmem:[%s1691_s3 + $0x68] sm:$0xff]  ;;  %v173_v9 = vld [vmem:[%s1691_s3 + $0x70] sm:$0xff] }
  0x16   :  { %977 = vmatprep.subr.bf16.mxu0 %v976_v42  ;;  %v1007_v8 = vpack.c.bf16 %v172_v6, %v171_v5  ;;  %v174_v10 = vld [vmem:[%s1691_s3 + $0x78] sm:$0xff]  ;;  %v253_v13 = vld [vmem:[%s1693_s5] sm:$0xff]  ;;  %v254_v14 = vld [vmem:[%s1693_s5 + $0x8] sm:$0xff] }
  0x17   :  { %999 = vmatpush3.bf16.msra.mxu1 %v998_v56  ;;  %v1010_v11 = vpack.c.bf16 %v174_v10, %v173_v9  ;;  %v255_v15 = vld [vmem:[%s1693_s5 + $0x10] sm:$0xff]  ;;  %v1013_v16 = vpack.c.bf16 %v254_v14, %v253_v13  ;;  %v256_v17 = vld [vmem:[%s1693_s5 + $0x18] sm:$0xff]  ;;  %v257_v19 = vld [vmem:[%s1693_s5 + $0x20] sm:$0xff] }
  0x18   :  { %1000 = vmatprep.subr.bf16.mxu1 %v1134_v7  ;;  %v1016_v18 = vpack.c.bf16 %v256_v17, %v255_v15  ;;  %v258_v20 = vld [vmem:[%s1693_s5 + $0x28] sm:$0xff]  ;;  %v259_v22 = vld [vmem:[%s1693_s5 + $0x30] sm:$0xff]  ;;  %v260_v23 = vld [vmem:[%s1693_s5 + $0x38] sm:$0xff] }
  0x19   :  { %979 = vmatpush3.bf16.msra.mxu0 %v978_v50  ;;  %v1019_v21 = vpack.c.bf16 %v258_v20, %v257_v19  ;;  %v1022_v24 = vpack.c.bf16 %v260_v23, %v259_v22  ;;  %v261_v25 = vld [vmem:[%s1693_s5 + $0x40] sm:$0xff]  ;;  %v262_v27 = vld [vmem:[%s1693_s5 + $0x48] sm:$0xff]  ;;  %v263_v29 = vld [vmem:[%s1693_s5 + $0x50] sm:$0xff] }
  0x1a   :  { %981 = vmatprep.subr.bf16.mxu0 %v980_v51  ;;  %v1025_v28 = vpack.c.bf16 %v262_v27, %v261_v25  ;;  %v264_v30 = vld [vmem:[%s1693_s5 + $0x58] sm:$0xff]  ;;  %v265_v32 = vld [vmem:[%s1693_s5 + $0x60] sm:$0xff]  ;;  %v266_v33 = vld [vmem:[%s1693_s5 + $0x68] sm:$0xff] }
  0x1b   :  { %1002 = vmatpush3.bf16.msra.mxu1 %v1001_v63  ;;  %v1028_v31 = vpack.c.bf16 %v264_v30, %v263_v29  ;;  %v1031_v34 = vpack.c.bf16 %v266_v33, %v265_v32  ;;  %v704_v36 = vld [vmem:[%s1690_s2] ss:$0 sm:$0xff]  ;;  %v267_v41 = vld [vmem:[%s1693_s5 + $0x70] sm:$0xff]  ;;  %v268_v42 = vld [vmem:[%s1693_s5 + $0x78] sm:$0xff] }
  0x1c   :  { %1003 = vmatprep.subr.bf16.mxu1 %v1134_v7  ;;  %v1034_v43 = vpack.c.bf16 %v268_v42, %v267_v41  ;;  %v347_v44 = vld [vmem:[%s1695_s7] sm:$0xff]  ;;  %v348_v45 = vld [vmem:[%s1695_s7 + $0x8] sm:$0xff]  ;;  %v349_v46 = vld [vmem:[%s1695_s7 + $0x10] sm:$0xff] }
  0x1d   :  { %983 = vmatpush3.bf16.msra.mxu0 %v982_v59  ;;  %v1037_v47 = vpack.c.bf16 %v348_v45, %v347_v44  ;;  %v350_v48 = vld [vmem:[%s1695_s7 + $0x18] sm:$0xff]  ;;  %v351_v50 = vld [vmem:[%s1695_s7 + $0x20] sm:$0xff]  ;;  %v352_v51 = vld [vmem:[%s1695_s7 + $0x28] sm:$0xff] }
  0x1e   :  { %985 = vmatprep.subr.bf16.mxu0 %v984_v60  ;;  %v1040_v49 = vpack.c.bf16 %v350_v48, %v349_v46  ;;  %v1043_v52 = vpack.c.bf16 %v352_v51, %v351_v50  ;;  %v353_v53 = vld [vmem:[%s1695_s7 + $0x30] sm:$0xff]  ;;  %v354_v54 = vld [vmem:[%s1695_s7 + $0x38] sm:$0xff]  ;;  %v355_v56 = vld [vmem:[%s1695_s7 + $0x40] sm:$0xff] }
  0x1f   :  { %1005 = vmatpush3.bf16.msra.mxu1 %v1004_v3  ;;  %v1046_v55 = vpack.c.bf16 %v354_v54, %v353_v53  ;;  %v356_v57 = vld [vmem:[%s1695_s7 + $0x48] sm:$0xff]  ;;  %v357_v59 = vld [vmem:[%s1695_s7 + $0x50] sm:$0xff]  ;;  %v358_v60 = vld [vmem:[%s1695_s7 + $0x58] sm:$0xff] }
  0x20   :  { %1006 = vmatprep.subr.bf16.mxu1 %v1134_v7  ;;  %v1049_v58 = vpack.c.bf16 %v356_v57, %v355_v56  ;;  %v1052_v61 = vpack.c.bf16 %v358_v60, %v357_v59  ;;  %v359_v62 = vld [vmem:[%s1695_s7 + $0x60] sm:$0xff]  ;;  %v360_v63 = vld [vmem:[%s1695_s7 + $0x68] sm:$0xff]  ;;  %v362_v9 = vld [vmem:[%s1695_s7 + $0x78] sm:$0xff] }
  0x21   :  { %987 = vmatpush3.bf16.msra.mxu0 %v986_v2  ;;  %v1055_v0 = vpack.c.bf16 %v360_v63, %v359_v62  ;;  %v705_v1 = vld [vmem:[%s1692_s4] ss:$0 sm:$0xff]  ;;  %v443_v13 = vld [vmem:[%s1697_s9 + $0x8] sm:$0xff]  ;;  %v444_v14 = vld [vmem:[%s1697_s9 + $0x10] sm:$0xff] }
  0x22   :  { %1012 = vmatprep.subr.bf16.mxu0 %v1134_v7  ;;  %v447_v19 = vld [vmem:[%s1697_s9 + $0x28] sm:$0xff]  ;;  %v449_v22 = vld [vmem:[%s1697_s9 + $0x38] sm:$0xff]  ;;  %v539_v44 = vld [vmem:[%s1699_s11 + $0x10] sm:$0xff] }
  0x23   :  { %1008 = vmatpush3.bf16.msra.mxu1 %v1007_v8  ;;  %v361_v8 = vld [vmem:[%s1695_s7 + $0x70] sm:$0xff]  ;;  %v451_v25 = vld [vmem:[%s1697_s9 + $0x48] sm:$0xff]  ;;  %v453_v29 = vld [vmem:[%s1697_s9 + $0x58] sm:$0xff]  ;;  %s1122_s7 = scalar_lea.hbm %s1702_s14, 16 }
  0x24   :  { %153 = vmatmul.mubr.f32.vlgmr.msra.gmra.mrb[0].mxu0 %v1360_v4  ;;  %1009 = vmatprep.subr.bf16.mxu1 %v1134_v7  ;;  %v1058_v10 = vpack.c.bf16 %v362_v9, %v361_v8  ;;  %v455_v32 = vld [vmem:[%s1697_s9 + $0x68] sm:$0xff]  ;;  %v540_v42 = vld [vmem:[%s1699_s11 + $0x18] sm:$0xff]  ;;  %v543_v50 = vld [vmem:[%s1699_s11 + $0x30] sm:$0xff]  ;;  %p1123_p0 = scmp.ne.s32.totalorder %s1702_s14, %s1122_s7  ;;  %p1126_p1 = scmp.lt.u32.totalorder %s1122_s7, %s1702_s14 }
  0x25   :  { %883 = vmatprep.mubr.msk.f32.mxu0 %vm1135_vm0, %v1136_v12  ;;  %1014 = vmatpush3.bf16.msra.mxu0 %v1013_v16  ;;  %v445_v16 = vld [vmem:[%s1697_s9 + $0x18] sm:$0xff]  ;;  %v538_v41 = vld [vmem:[%s1699_s11 + $0x8] sm:$0xff]  ;;  %v547_v56 = vld [vmem:[%s1699_s11 + $0x50] sm:$0xff] }
  0x26   :  { %1015 = vmatprep.subr.bf16.mxu0 %v1134_v7  ;;  %v1064_v17 = vpack.c.bf16 %v445_v16, %v444_v14  ;;  %v542_v45 = vld [vmem:[%s1699_s11 + $0x28] sm:$0xff]  ;;  %v544_v46 = vld [vmem:[%s1699_s11 + $0x38] sm:$0xff]  ;;  %v551_v62 = vld [vmem:[%s1699_s11 + $0x70] sm:$0xff]  ;;  %p1128_p2 = pnand %p1126_p1, %p1123_p0 }
  0x27   :  { %1011 = vmatpush3.bf16.msra.mxu1 %v1010_v11  ;;  %v442_v11 = vld [vmem:[%s1697_s9] sm:$0xff]  ;;  %v1088_v48 = vpack.c.bf16 %v544_v46, %v542_v45  ;;  %v546_v51 = vld [vmem:[%s1699_s11 + $0x48] sm:$0xff]  ;;  %v560_v8 = vld [vmem:[%s1699_s11 + $0xb8] sm:$0xff] }
  0x28   :  { %1036 = vmatprep.subr.bf16.mxu1 %v1134_v7  ;;  %v1061_v15 = vpack.c.bf16 %v443_v13, %v442_v11  ;;  %v550_v57 = vld [vmem:[%s1699_s11 + $0x68] sm:$0xff]  ;;  %v557_v11 = vld [vmem:[%s1699_s11 + $0xa0] sm:$0xff]  ;;  %v559_v13 = vld [vmem:[%s1699_s11 + $0xb0] sm:$0xff] }
  0x29   :  { %1017 = vmatpush3.bf16.msra.mxu0 %v1016_v18  ;;  %v446_v18 = vld [vmem:[%s1697_s9 + $0x20] sm:$0xff]  ;;  %v554_v63 = vld [vmem:[%s1699_s11 + $0x88] sm:$0xff]  ;;  %v1106_v16 = vpack.c.bf16 %v559_v13, %v557_v11 }
  0x2a   :  { %1018 = vmatprep.subr.bf16.mxu0 %v1134_v7  ;;  %v1067_v20 = vpack.c.bf16 %v447_v19, %v446_v18  ;;  %v562_v14 = vld [vmem:[%s1699_s11 + $0xc8] sm:$0xff]  ;;  %v561_v18 = vld [vmem:[%s1699_s11 + $0xc0] sm:$0xff]  ;;  %v563_v19 = vld [vmem:[%s1699_s11 + $0xd0] sm:$0xff] }
  0x2d   :  { %1020 = vmatpush3.bf16.msra.mxu0 %v1019_v21  ;;  %v448_v21 = vld [vmem:[%s1697_s9 + $0x30] sm:$0xff] }
  0x2e   :  { %1021 = vmatprep.subr.bf16.mxu0 %v1134_v7  ;;  %v1070_v23 = vpack.c.bf16 %v449_v22, %v448_v21  ;;  %v707_v21 = vld [vmem:[%s1696_s8] ss:$0 sm:$0xff] }
  0x31   :  { %1023 = vmatpush3.bf16.msra.mxu0 %v1022_v24  ;;  %v450_v24 = vld [vmem:[%s1697_s9 + $0x40] sm:$0xff] }
  0x32   :  { %1024 = vmatprep.subr.bf16.mxu0 %v1134_v7  ;;  %v1073_v27 = vpack.c.bf16 %v451_v25, %v450_v24 }
  0x35   :  { %1026 = vmatpush3.bf16.msra.mxu0 %v1025_v28  ;;  %v452_v28 = vld [vmem:[%s1697_s9 + $0x50] sm:$0xff] }
  0x36   :  { %1027 = vmatprep.subr.bf16.mxu0 %v1134_v7  ;;  %v1076_v30 = vpack.c.bf16 %v453_v29, %v452_v28  ;;  %v568_v28 = vld [vmem:[%s1699_s11 + $0xf8] sm:$0xff] }
  0x39   :  { %1029 = vmatpush3.bf16.msra.mxu0 %v1028_v31  ;;  %v454_v31 = vld [vmem:[%s1697_s9 + $0x60] sm:$0xff] }
  0x3a   :  { %1030 = vmatprep.subr.bf16.mxu0 %v1134_v7  ;;  %v1079_v33 = vpack.c.bf16 %v455_v32, %v454_v31  ;;  %v567_v31 = vld [vmem:[%s1699_s11 + $0xf0] sm:$0xff] }
  0x3d   :  { %1032 = vmatpush3.bf16.msra.mxu0 %v1031_v34  ;;  %v706_v34 = vld [vmem:[%s1694_s6] ss:$0 sm:$0xff] }
  0x3e   :  { %1033 = vmatprep.subr.bf16.mxu0 %v1134_v7 }
  0x41   :  { %1035 = vmatpush3.bf16.msra.mxu0 %v1034_v43  ;;  %v1084_v43 = vpack.c.bf16 %v540_v42, %v538_v41 }
  0x42   :  { %1060 = vmatprep.subr.bf16.mxu0 %v1134_v7 }
  0xf7   :  { %v745_v35 = vpop.f32.mrb[0].mxu0 }
  0xf8   :  { %v746_v37 = vpop.f32.mrb[1].mxu0 }
  0xf9   :  { %v747_v38 = vadd.f32 %v746_v37, %v745_v35 }
  0xfb   :  { %v155_v39 = vadd.f32 %v747_v38, %v704_v36 }
  0xfd   :  { %v158_v40 = vmax.f32 %v155_v39, 0.0  ;;  %v456_v39 = vld [vmem:[%s1697_s9 + $0x70] sm:$0xff] }
  0xff   :  { %849 = vmatmul.mubr.f32.vlgmr.msra.gmra.mrb[0].mxu1 %v158_v40  ;;  %v457_v40 = vld [vmem:[%s1697_s9 + $0x78] sm:$0xff] }
 0x100   :  { %918 = vmatprep.mubr.msk.f32.mxu1 %vm1135_vm0, %v1136_v12  ;;  %1038 = vmatpush3.bf16.msra.mxu1 %v1037_v47 }
 0x101   :  { %1039 = vmatprep.subr.bf16.mxu1 %v1134_v7 }
 0x104   :  { %1041 = vmatpush3.bf16.msra.mxu1 %v1040_v49  ;;  %v541_v49 = vld [vmem:[%s1699_s11 + $0x20] sm:$0xff] }
 0x105   :  { %1042 = vmatprep.subr.bf16.mxu1 %v1134_v7  ;;  %v1090_v53 = vpack.c.bf16 %v543_v50, %v541_v49 }
 0x108   :  { %1044 = vmatpush3.bf16.msra.mxu1 %v1043_v52  ;;  %v548_v52 = vld [vmem:[%s1699_s11 + $0x58] sm:$0xff] }
 0x109   :  { %1045 = vmatprep.subr.bf16.mxu1 %v1134_v7  ;;  %v1092_v54 = vpack.c.bf16 %v548_v52, %v546_v51 }
 0x10c   :  { %1047 = vmatpush3.bf16.msra.mxu1 %v1046_v55  ;;  %v545_v55 = vld [vmem:[%s1699_s11 + $0x40] sm:$0xff] }
 0x10d   :  { %1048 = vmatprep.subr.bf16.mxu1 %v1134_v7  ;;  %v1094_v59 = vpack.c.bf16 %v547_v56, %v545_v55 }
 0x110   :  { %1050 = vmatpush3.bf16.msra.mxu1 %v1049_v58  ;;  %v552_v58 = vld [vmem:[%s1699_s11 + $0x78] sm:$0xff] }
 0x111   :  { %1051 = vmatprep.subr.bf16.mxu1 %v1134_v7  ;;  %v1096_v60 = vpack.c.bf16 %v552_v58, %v550_v57 }
 0x114   :  { %1053 = vmatpush3.bf16.msra.mxu1 %v1052_v61  ;;  %v549_v61 = vld [vmem:[%s1699_s11 + $0x60] sm:$0xff] }
 0x115   :  { %1054 = vmatprep.subr.bf16.mxu1 %v1134_v7 }
 0x118   :  { %1056 = vmatpush3.bf16.msra.mxu1 %v1055_v0  ;;  %v556_v0 = vld [vmem:[%s1699_s11 + $0x98] sm:$0xff] }
 0x119   :  { %1057 = vmatprep.subr.bf16.mxu1 %v1134_v7 }
 0x11c   :  { %1059 = vmatpush3.bf16.msra.mxu1 %v1058_v10 }
 0x11d   :  { %1085 = vmatprep.subr.bf16.mxu1 %v1084_v43 }
 0x1d2   :  { %v248_v2 = vpop.f32.mrb[0].mxu1 }
 0x1d3   :  { %v249_v3 = vadd.f32 %v705_v1, %v248_v2  ;;  %v850_v5 = vpop.f32.mrb[1].mxu1  ;;  %v1098_v1 = vpack.c.bf16 %v551_v62, %v549_v61  ;;  %v1100_v2 = vpack.c.bf16 %v556_v0, %v554_v63 }
 0x1d4   :  { %v555_v5 = vld [vmem:[%s1699_s11 + $0x90] sm:$0xff] }
 0x1d5   :  { %v252_v6 = vmax.f32 %v249_v3, 0.0  ;;  %v553_v3 = vld [vmem:[%s1699_s11 + $0x80] sm:$0xff] }
 0x1d6   :  { %v1102_v9 = vpack.c.bf16 %v555_v5, %v553_v3 }
 0x1d7   :  { %884 = vmatmul.mubr.f32.vlgmr.msra.gmra.mrb[2].mxu0 %v252_v6  ;;  %v558_v6 = vld [vmem:[%s1699_s11 + $0xa8] sm:$0xff] }
 0x1d8   :  { %953 = vmatprep.mubr.msk.f32.mxu0 %vm1135_vm0, %v1136_v12  ;;  %1062 = vmatpush3.bf16.msra.mxu0 %v1061_v15  ;;  %v1104_v10 = vpack.c.bf16 %v560_v8, %v558_v6  ;;  %v564_v15 = vld [vmem:[%s1699_s11 + $0xd8] sm:$0xff] }
 0x1d9   :  { %1063 = vmatprep.subr.bf16.mxu0 %v1134_v7 }
 0x1dc   :  { %1065 = vmatpush3.bf16.msra.mxu0 %v1064_v17  ;;  %v1108_v17 = vpack.c.bf16 %v564_v15, %v562_v14 }
 0x1dd   :  { %1066 = vmatprep.subr.bf16.mxu0 %v1134_v7 }
 0x1e0   :  { %1068 = vmatpush3.bf16.msra.mxu0 %v1067_v20  ;;  %v1110_v20 = vpack.c.bf16 %v563_v19, %v561_v18 }
 0x1e1   :  { %1069 = vmatprep.subr.bf16.mxu0 %v1134_v7 }
 0x1e4   :  { %1071 = vmatpush3.bf16.msra.mxu0 %v1070_v23 }
 0x1e5   :  { %1072 = vmatprep.subr.bf16.mxu0 %v1134_v7 }
 0x1e8   :  { %1074 = vmatpush3.bf16.msra.mxu0 %v1073_v27  ;;  %v566_v27 = vld [vmem:[%s1699_s11 + $0xe8] sm:$0xff] }
 0x1e9   :  { %1075 = vmatprep.subr.bf16.mxu0 %v1134_v7  ;;  %v1112_v29 = vpack.c.bf16 %v568_v28, %v566_v27 }
 0x1ec   :  { %1077 = vmatpush3.bf16.msra.mxu0 %v1076_v30  ;;  %v565_v30 = vld [vmem:[%s1699_s11 + $0xe0] sm:$0xff] }
 0x1ed   :  { %1078 = vmatprep.subr.bf16.mxu0 %v1134_v7  ;;  %v1114_v32 = vpack.c.bf16 %v567_v31, %v565_v30 }
 0x1f0   :  { %1080 = vmatpush3.bf16.msra.mxu0 %v1079_v33  ;;  %v709_v33 = vld [vmem:[%s1698_s10] ss:$0 sm:$0xff] }
 0x1f1   :  { %1081 = vmatprep.subr.bf16.mxu0 %v1134_v7  ;;  %v1082_v7 = vpack.c.bf16 %v457_v40, %v456_v39 }
 0x1f4   :  { %1083 = vmatpush3.bf16.msra.mxu0 %v1082_v7  ;;  %v569_v7 = vld [vmem:[%s1700_s12] sm:$0x3] }
 0x2aa   :  { %v342_v35 = vpop.f32.mrb[2].mxu0 }
 0x2ab   :  { %v343_v36 = vadd.f32 %v706_v34, %v342_v35  ;;  %v885_v37 = vpop.f32.mrb[3].mxu0 }
 0x2ad   :  { %v346_v38 = vmax.f32 %v343_v36, 0.0 }
 0x2af   :  { %919 = vmatmul.mubr.f32.vlgmr.msra.gmra.mrb[2].mxu1 %v346_v38  ;;  %v571_v38 = vlaneseq }
 0x2b0   :  { %645 = vmatprep.mubr.f32.mxu1 %v1136_v12  ;;  %v537_v12 = vld [vmem:[%s1699_s11] sm:$0xff] }
 0x2b1   :  { %v1086_v47 = vpack.c.bf16 %v539_v44, %v537_v12  ;;  %v572_v39 = vshrl.u32 %v571_v38, 7 }
 0x2b3   :  { %1087 = vmatpush1.bf16.msra.mxu1 %v1086_v47  ;;  %v573_v40 = vsub.s32 0, %v572_v39  ;;  %v577_v41 = vsub.s32 1, %v572_v39  ;;  %vm672_vm1 = vcmp.lt.s32.totalorder %v572_v39, 2 }
 0x2b4   :  { %1089 = vmatprep.subr.bf16.mxu1 %v1088_v48 }
 0x2b5   :  { %v574_v42 = vrot.slane %v569_v7, %v573_v40  ;;  %v578_v12 = vrot.slane %v569_v7, %v577_v41 }
 0x2b7   :  { %1091 = vmatpush1.bf16.msra.mxu1 %v1090_v53 }
 0x2b8   :  { %1093 = vmatprep.subr.bf16.mxu1 %v1092_v54 }
 0x2bb   :  { %1095 = vmatpush1.bf16.msra.mxu1 %v1094_v59 }
 0x2bc   :  { %1097 = vmatprep.subr.bf16.mxu1 %v1096_v60 }
 0x2bf   :  { %1099 = vmatpush1.bf16.msra.mxu1 %v1098_v1 }
 0x2c0   :  { %1101 = vmatprep.subr.bf16.mxu1 %v1100_v2 }
 0x2c3   :  { %1103 = vmatpush1.bf16.msra.mxu1 %v1102_v9 }
 0x2c4   :  { %1105 = vmatprep.subr.bf16.mxu1 %v1104_v10 }
 0x2c7   :  { %1107 = vmatpush1.bf16.msra.mxu1 %v1106_v16 }
 0x2c8   :  { %1109 = vmatprep.subr.bf16.mxu1 %v1108_v17 }
 0x2cb   :  { %1111 = vmatpush1.bf16.msra.mxu1 %v1110_v20 }
 0x2cc   :  { %1113 = vmatprep.subr.bf16.mxu1 %v1112_v29 }
 0x2cf   :  { %1115 = vmatpush1.bf16.msra.mxu1 %v1114_v32 }
 0x382   :  { %v436_v22 = vpop.f32.mrb[2].mxu1 }
 0x383   :  { %v437_v23 = vadd.f32 %v707_v21, %v436_v22  ;;  %v920_v24 = vpop.f32.mrb[3].mxu1 }
 0x385   :  { %v708_v25 = vclamps-f32 %v437_v23, 1.0 }
 0x387   :  { %954 = vmatmul.mubr.f32.vlgmr.msra.gmra.mrb[4].mxu0 %v708_v25 }
 0x45a   :  { %v531_v34 = vpop.f32.mrb[4].mxu0 }
 0x45b   :  { %v532_v35 = vadd.f32 %v709_v33, %v531_v34  ;;  %v955_v36 = vpop.f32.mrb[5].mxu0 }
 0x45d   :  { %v710_v37 = vclamps-f32 %v532_v35, 1.0 }
 0x45f   :  { %646 = vmatmul.mubr.f32.vlgmr.msra.gmra.mrb[4].mxu1 %v710_v37 }
 0x532   :  { %v647_v43 = vpop.f32.mrb[4].mxu1 }
 0x533   :  { %v648_v44 = vadd.f32 %v647_v43, %v574_v42  ;;  %v649_v45 = vpop.f32.mrb[5].mxu1 }
 0x534   :  { %v650_v46 = vadd.f32 %v649_v45, %v578_v12 }
 0x535   :  { %v711_v47 = vclamps-f32 %v648_v44, 1.0 }
 0x536   :  { %v712_v48 = vclamps-f32 %v650_v46, 1.0 }
 0x537   :  { %656 = vst [vmem:[%s1701_s13] sm:$0xff] %v711_v47  ;;  %v658_v49 = vsub.f32 %v711_v47, %v1360_v4 }
 0x538   :  { %657 = vst [vmem:[%s1701_s13 + $0x8] sm:$0xff] %v712_v48  ;;  %v659_v50 = vsub.f32 %v712_v48, %v1271_v26 }
 0x539   :  { %v660_v51 = vadd.f32 1e-06, %v658_v49 }
 0x53a   :  { %v661_v52 = vadd.f32 1e-06, %v659_v50 }
 0x53b   :  { %v662_v53 = vand.u32 2147483647, %v660_v51 }
 0x53c   :  { %v663_v54 = vand.u32 2147483647, %v661_v52 }
 0x53e   :  { %v664_v55 = vadd.f32 %v663_v54, %v662_v53 }
 0x540   :  { %665 = vadd.xlane.f32.xlu0 %v664_v55 }
 0x5cd   :  { %v666_v56 = vpop.xlane.xlu0 %665 }
 0x5ce   :  { %v673_v57 = vsel %vm672_vm1, %v666_v56, 0.0 }
 0x5cf   :  { %v675_v58 = vsel %vm674_vm2, %v673_v57, 0.0 }
 0x5d0   :  { %676 = vadd.xlane.f32.xlu0 %v675_v58 }
 0x65d   :  { %v677_v59 = vpop.xlane.xlu0 %676 }
 0x65e   :  { %v678_v4 = vrot.slane %v677_v59, 4 }
 0x660   :  { %v679_v60 = vadd.f32 %v678_v4, %v677_v59 }
 0x662   :  { %v680_v61 = vrot.slane %v679_v60, 2 }
 0x664   :  { %v681_v62 = vadd.f32 %v680_v61, %v679_v60 }
 0x666   :  { %v682_v63 = vrot.slane %v681_v62, 1 }
 0x668   :  { %v683_v0 = vadd.f32 %v682_v63, %v681_v62 }
 0x66a   :  { %1116 = vpush %v683_v0 }
 0x69b   :  { %s1117_s12 = spop %1116 }
 0x69c   :  { %686 = sst [smem:[#allocation2]] %s1117_s12 }
 0x69d   :  { %1131 = shalt.err (!%p1128_p2)
}
 0x69e   :  { %s1137_s6 = smov [#allocation2]  }
 0x69f   :  { %696 = dma.smem_to_hbm %s1137_s6, 16, %s1702_s14, [#allocation3]  }
 0x6a0   :  { %1132 = dma.done.wait [#allocation3], 16  }
 0x6a1   :  { %1133 = vsyncadd [#allocation3], 4294967280 }
 0x6a2   :  { %702 = sfence }
 0x6a3   :  { %703 = vsyncpa [#allocation3], 1 }

</bundles_post_ra>
